<compile_context>
chip_gen: v6e
topology: v6e:2x2x1
jax: 0.10.0
libtpu: 0.0.40
codegen_flags: <defaults>
</compile_context>

<pallas_src>
import functools

import jax
import jax.numpy as jnp
from jax.experimental import pallas as pl
from jax.experimental.pallas import tpu as pltpu


# Equivalent of e3nn Irreps("4x0e + 2x1o + 1x2e"): list of (mul, ir_dim).
IRREPS_HEAD = [(4, 1), (2, 3), (1, 5)]   # dims: 4 + 6 + 5 = 15


def build_head_indices(irreps_head):
    """Mirror of AttnHeads2Vec.__init__: (start, end) per irrep block."""
    head_indices = []
    start_idx = 0
    for mul, ir_dim in irreps_head:
        head_indices.append((start_idx, start_idx + mul * ir_dim))
        start_idx += mul * ir_dim
    return head_indices, start_idx  # (indices, total per-head dim D)


def _round_up(n, m):
    return ((n + m - 1) // m) * m


def _attn_heads2vec_kernel(x_ref, o_ref, *, head_indices, num_heads, head_dim):
    # x_ref: (tn, H*D) VMEM tile, row layout [head0 | head1 | ...].
    # o_ref: (tn, H*D) VMEM tile, row layout [seg0: h0..hH-1 | seg1: ... | ...].
    # Read once, build the permuted tile in registers (static lane slices +
    # one lane-axis concatenate), store once.
    x = x_ref[...]
    parts = []
    for (s, e) in head_indices:
        for h in range(num_heads):
            parts.append(x[:, h * head_dim + s: h * head_dim + e])
    o_ref[...] = jnp.concatenate(parts, axis=-1)


def attn_heads2vec(x, irreps_head=IRREPS_HEAD, *, tn=8192):
    """x: [N, H, D] -> [N, H*D] with segment-major / head-minor ordering."""
    head_indices, D = build_head_indices(irreps_head)
    N, H, Dx = x.shape
    assert Dx == D, f"last dim {Dx} does not match irreps_head dim {D}"
    HD = H * D
    itemsize = jnp.dtype(x.dtype).itemsize

    # Free flatten: row-major [N, H, D] has the same layout as [N, H*D].
    x2 = x.reshape(N, HD)

    # Dtype-aware sublane multiple: 8 rows (f32), 16 (bf16), 32 (int8/fp8).
    sub = max(8, 32 // itemsize)
    # Row tile: large for bandwidth, but keep >= ~4 grid steps for mid-size N
    # (so the parallel row axis feeds both TensorCores on v7x with warmed
    # pipelines).  No wrapper padding: Pallas masks the partial last block.
    tn_eff = min(_round_up(tn, sub), max(_round_up(pl.cdiv(N, 4), sub), sub))
    grid = (pl.cdiv(N, tn_eff),)

    kernel = functools.partial(
        _attn_heads2vec_kernel,
        head_indices=tuple(head_indices), num_heads=H, head_dim=D)

    return pl.pallas_call(
        kernel,
        out_shape=jax.ShapeDtypeStruct((N, HD), x.dtype),
        grid_spec=pltpu.PrefetchScalarGridSpec(
            num_scalar_prefetch=0,
            grid=grid,
            in_specs=[pl.BlockSpec((tn_eff, HD), lambda i: (i, 0))],
            out_specs=pl.BlockSpec((tn_eff, HD), lambda i: (i, 0)),
        ),
        compiler_params=pltpu.CompilerParams(
            dimension_semantics=("parallel",),
            vmem_limit_bytes=32 << 20),
        cost_estimate=pl.CostEstimate(
            flops=0, transcendentals=0,
            bytes_accessed=2 * N * HD * itemsize),
    )(x2)


# --- reference (plain JAX, mirrors the PyTorch forward) ---------------------
def attn_heads2vec_ref(x, irreps_head=IRREPS_HEAD):
    head_indices, _ = build_head_indices(irreps_head)
    N = x.shape[0]
    out = [x[:, :, s:e].reshape(N, -1) for (s, e) in head_indices]
    return jnp.concatenate(out, axis=1)


if __name__ == "__main__":
    _, D = build_head_indices(IRREPS_HEAD)   # D = 15
    H = 4

    # Small case: 2 tiles of 8 rows.
    N = 16
    x = jax.random.normal(jax.random.PRNGKey(0), (N, H, D), dtype=jnp.float32)
    out = jax.block_until_ready(attn_heads2vec(x))
    ref = attn_heads2vec_ref(x)
    assert out.shape == (N, H * D), out.shape
    assert jnp.array_equal(out, ref), "mismatch vs reference (small N)"

    # Non-divisible case: exercises cdiv grid + Pallas partial last block
    # (no wrapper pad / unpad slice anymore).
    N2 = 2500
    x_big = jax.random.normal(jax.random.PRNGKey(1), (N2, H, D),
                              dtype=jnp.float32)
    out2 = jax.block_until_ready(attn_heads2vec(x_big))
    ref2 = attn_heads2vec_ref(x_big)
    assert out2.shape == (N2, H * D), out2.shape
    assert jnp.array_equal(out2, ref2), "mismatch vs reference (partial block)"

    # bf16 case: exercises dtype-aware sublane rounding (16-row multiples)
    # plus a partial packed-sublane last block.
    N3 = 100
    x_bf = jax.random.normal(jax.random.PRNGKey(2),
                             (N3, H, D)).astype(jnp.bfloat16)
    out3 = jax.block_until_ready(attn_heads2vec(x_bf))
    ref3 = attn_heads2vec_ref(x_bf)
    assert out3.shape == (N3, H * D) and out3.dtype == jnp.bfloat16
    assert jnp.array_equal(out3, ref3), "mismatch vs reference (bf16)"

    print("KERNEL_OK")
</pallas_src>

<mosaic_0001>
module attributes {stable_mosaic.version = 11 : i64} {
  func.func @_attn_heads2vec_kernel(%arg0: i32, %arg1: memref<8x60xf32, #tpu.memory_space<vmem>>, %arg2: memref<8x60xf32, #tpu.memory_space<vmem>>) attributes {dimension_semantics = [#tpu.dimension_semantics<parallel>], iteration_bounds = array<i64: 2>, scalar_prefetch = 0 : i64, scratch_operands = 0 : i64, tpu.core_type = #tpu.core_type<tc>, window_params = [{transform_indices = @transform_0, window_bounds = array<i64: 8, 60>}, {transform_indices = @transform_1, window_bounds = array<i64: 8, 60>}]} {
    %c0 = arith.constant 0 : index
    %c0_0 = arith.constant 0 : index
    %0 = vector.load %arg1[%c0, %c0_0] : memref<8x60xf32, #tpu.memory_space<vmem>>, vector<8x60xf32>
    %1 = vector.extract_strided_slice %0 {offsets = [0, 0], sizes = [8, 4], strides = [1, 1]} : vector<8x60xf32> to vector<8x4xf32>
    %2 = vector.extract_strided_slice %0 {offsets = [0, 15], sizes = [8, 4], strides = [1, 1]} : vector<8x60xf32> to vector<8x4xf32>
    %3 = vector.extract_strided_slice %0 {offsets = [0, 30], sizes = [8, 4], strides = [1, 1]} : vector<8x60xf32> to vector<8x4xf32>
    %4 = vector.extract_strided_slice %0 {offsets = [0, 45], sizes = [8, 4], strides = [1, 1]} : vector<8x60xf32> to vector<8x4xf32>
    %5 = vector.extract_strided_slice %0 {offsets = [0, 4], sizes = [8, 6], strides = [1, 1]} : vector<8x60xf32> to vector<8x6xf32>
    %6 = vector.extract_strided_slice %0 {offsets = [0, 19], sizes = [8, 6], strides = [1, 1]} : vector<8x60xf32> to vector<8x6xf32>
    %7 = vector.extract_strided_slice %0 {offsets = [0, 34], sizes = [8, 6], strides = [1, 1]} : vector<8x60xf32> to vector<8x6xf32>
    %8 = vector.extract_strided_slice %0 {offsets = [0, 49], sizes = [8, 6], strides = [1, 1]} : vector<8x60xf32> to vector<8x6xf32>
    %9 = vector.extract_strided_slice %0 {offsets = [0, 10], sizes = [8, 5], strides = [1, 1]} : vector<8x60xf32> to vector<8x5xf32>
    %10 = vector.extract_strided_slice %0 {offsets = [0, 25], sizes = [8, 5], strides = [1, 1]} : vector<8x60xf32> to vector<8x5xf32>
    %11 = vector.extract_strided_slice %0 {offsets = [0, 40], sizes = [8, 5], strides = [1, 1]} : vector<8x60xf32> to vector<8x5xf32>
    %12 = vector.extract_strided_slice %0 {offsets = [0, 55], sizes = [8, 5], strides = [1, 1]} : vector<8x60xf32> to vector<8x5xf32>
    %13 = tpu.concatenate %1, %2, %3, %4, %5, %6, %7, %8, %9, %10, %11, %12 in 1 : vector<8x4xf32>, vector<8x4xf32>, vector<8x4xf32>, vector<8x4xf32>, vector<8x6xf32>, vector<8x6xf32>, vector<8x6xf32>, vector<8x6xf32>, vector<8x5xf32>, vector<8x5xf32>, vector<8x5xf32>, vector<8x5xf32> -> vector<8x60xf32>
    %c0_1 = arith.constant 0 : index
    %c0_2 = arith.constant 0 : index
    %14 = vector.load %arg2[%c0_1, %c0_2] : memref<8x60xf32, #tpu.memory_space<vmem>>, vector<8x60xf32>
    tpu.vector_store %arg2[%c0_1, %c0_2], %13 {strides = array<i32>} : memref<8x60xf32, #tpu.memory_space<vmem>>, vector<8x60xf32>,
    return
  }
  func.func @transform_0(%arg0: i32) -> (i32, i32) {
    %c0_i32 = arith.constant 0 : i32
    %c0_i32_0 = arith.constant 0 : i32
    return %arg0, %c0_i32 : i32, i32
  }
  func.func @transform_1(%arg0: i32) -> (i32, i32) {
    %c0_i32 = arith.constant 0 : i32
    %c0_i32_0 = arith.constant 0 : i32
    return %arg0, %c0_i32 : i32, i32
  }
}

</mosaic_0001>

<bundles_post_ra>
// kernel: tpu_custom_call.1
= control target key start
LH: loop header
LB: loop body
LE: loop exit
PB: predicated region body
PF: predicated region fallthrough
CT: control target
= control target key end

     0   :  { %6 = vsyncpa [#allocation3], 0  ;;  %s607_s0 = inlined_call_operand.hbm [shape: f32[16,60], index: 0, kind: input, shape index: {}]   ;;  %s608_s1 = inlined_call_operand.hbm [shape: f32[16,60], index: 1, kind: output, shape index: {}]  }
   0x1   :  { %8 = vsyncpa [#allocation3 + $0x1], 0 }
   0x2   :  { %9 = vsyncpa [#allocation4], 0 }
   0x3   :  { %11 = vsyncpa [#allocation4 + $0x1], 0  ;;  %s456_s6 = smov 0   ;;  %s458_s7 = smov 0  }
   0x4   :  { %s460_s8 = smov 0   ;;  %s462_s9 = smov 0  }
   0x5 LB: > { %s477_s10 = sadd.s32 4294967295, %s432_s9   ;;  %s272_s11 = sadd.s32 4294967294, %s432_s9   ;;  %s432_s9 = sphi %s462_s9, %s625_s9   ;;  %s428_s8 = sphi %s460_s8, %s624_s8   ;;  %s424_s7 = sphi %s458_s7, %s623_s7   ;;  %s420_s6 = sphi %s456_s6, %s622_s6  }
   0x6   : > { %s481_s12 = sadd.s32 1, %s432_s9   ;;  %s24_s13 = sadd.s32 1, %s428_s8 }
   0x7   : > { %s21_s14 = ssub.s32 %s432_s9, %s481_s12  ;;  %p31_p0 = scmp.ne.s32.totalorder %s428_s8, %s424_s7 }
   0x8   : > { %p22_p1 = scmp.eq.s32.totalorder %s21_s14, 0  ;;  %p32_p2 = scmp.eq.s32.totalorder %s432_s9, 0 }
   0x9   : > { %p37_p3 = scmp.ne.s32.totalorder %s424_s7, %s420_s6  ;;  %p38_p4 = scmp.eq.s32.totalorder %s477_s10, 0 }
   0xa   : > { %s493_s15 = scalar_select %p22_p1, %s428_s8, %s24_s13  }
   0xb   : > { %p495_p5 = por %p32_p2, %p31_p0  ;;  %p499_p6 = por %p38_p4, %p37_p3 }
   0xc   : > { %p61_p7 = scmp.eq.s32.totalorder %s477_s10, 1  ;;  %p67_p8 = scmp.eq.s32.totalorder %s272_s11, 1 }
   0xd   : > { %s612_s17 = scalar_select %p499_p6, 1, 0 }
   0xe   : > { %p296_p10 = scmp.lt.s32.totalorder %s432_s9, 2  ;;  %p506_p11 = por %p61_p7, %p31_p0 }
   0xf   : > { %p510_p12 = por %p67_p8, %p37_p3  ;;  %s87_s20 = sand.u32 1, %s428_s8  }
  0x10   : > { %s613_s18 = scalar_select %p506_p11, 1, 0 }
  0x11   : > { %s614_s19 = scalar_select %p510_p12, 1, 0 }
  0x12   : > { %s276_s21 = sshll.u32 %s432_s9, 7  ;;  %s275_s22 = sshll.u32 %s87_s20, 3 }
  0x13   : > { %s519_s25 = scalar_lea.hbm %s607_s0, %s276_s21  ;;  %s91_s26 = scalar_lea.vmem [#allocation2], %s275_s22 }
  0x14   : > { %s98_s27 = sshll.u32 %s91_s26, 4  ;;  %p523_p13 = pnand %p296_p10, %p495_p5  ;;  %s527_s27 = int_to_ptr.vmem [resolvable:$true] %s98_s27 }
  0x15   : > { %s88_s29 = scalar_lea.sflag [#allocation3], %s87_s20  ;;  %s340_s30 = scalar_lea.hbm %s519_s25, 128 }
  0x16   : > { %p341_p2 = scmp.ne.s32.totalorder %s519_s25, %s340_s30  ;;  %p342_p3 = pneg %p523_p13 }
  0x17   : > { %s345_s4 = scalar_lea.hbm %s607_s0, 256  ;;  %p346_p5 = scmp.lt.s32.totalorder %s519_s25, %s607_s0 }
  0x18   : > { %p343_p4 = pnand %p342_p3, %p341_p2  ;;  %p347_p8 = scmp.lt.s32.totalorder %s345_s4, %s340_s30 }
  0x1a   : > { %p344_p7 = pneg %p343_p4  ;;  %p348_p10 = por %p347_p8, %p346_p5 }
  0x1c   : > { %p349_p9 = pnand %p348_p10, %p344_p7 }
  0x1e   : > { %352 = shalt.err (!%p349_p9)
}
  0x1f   : > { %s353_s13 = scalar_lea.vmem %s527_s27, 128  ;;  %s434_s14 = smov [#allocation2]  }
  0x20   : > { %p354_p0 = scmp.ne.s32.totalorder %s527_s27, %s353_s13  ;;  %s358_s16 = sshll.u32 %s434_s14, 4  ;;  %s359_s16 = int_to_ptr.vmem [resolvable:$false] %s358_s16 }
  0x21   : > { %s360_s20 = scalar_lea.vmem %s359_s16, 256  ;;  %p361_p4 = scmp.lt.s32.totalorder %s527_s27, %s359_s16 }
  0x22   : > { %p356_p1 = pnand %p354_p0, %p342_p3  ;;  %p362_p12 = scmp.lt.s32.totalorder %s360_s20, %s353_s13 }
  0x24   : > { %p357_p2 = pneg %p356_p1  ;;  %p363_p11 = por %p362_p12, %p361_p4 }
  0x26   : > { %p364_p6 = pnand %p363_p11, %p357_p2 }
  0x28   : > { %367 = shalt.err (!%p364_p6)
}
  0x29   : > { %291 = dma.hbm_to_vmem [thread:$0]  (!%p523_p13), %s519_s25, 128, %s527_s27, %s88_s29  }
  0x2a   : > { %p616_p9 = scmp.lt.s32.totalorder %s432_s9, 3  ;;  %p617_p7 = scmp.ge.s32.totalorder %s432_s9, 1 }
  0x2c   : > { %p104_p0 = pnand %p617_p7, %p616_p9 }
  0x2d   : > { %s554_s21 = sand.u32 (!%p104_p0), 1, %s424_s7   ;;  %p618_p6 = scmp.ne.s32.totalorder (!%p104_p0), %s612_s17, 0 }
  0x2e   : > { %107 = sbr.rel (%p104_p0) target bundleno = 200 (0xc8), region = 24  ;;  %s278_s22 = sshll.u32 (!%p104_p0), %s554_s21, 3 }
  0x2f   : > { %s110_s23 = scalar_lea.sflag (!%p104_p0), [#allocation3], %s554_s21  ;;  %s113_s24 = scalar_lea.vmem (!%p104_p0), [#allocation2], %s278_s22 }
  0x33   : > { %411 = dma.done.wait (%p618_p6), %s110_s23, 128  }
  0x34   : > { %413 = vsyncadd (%p618_p6), %s110_s23, 4294967168  ;;  %v132_v0 = vld [vmem:[%s113_s24] sm:$0xff]  ;;  %s435_s25 = smov 117   ;;  %s436_s26 = smov 95   ;;  %vm164_vm0 = vcmask 31744   ;;  %vm166_vm1 = vcmask 64512  }
  0x35   : > { %134 = vrot.lane.b32.xlu0 %v132_v0, %s435_s25  ;;  %140 = vrot.lane.b32.xlu1 %v132_v0, %s436_s26  ;;  %s437_s27 = smov 106   ;;  %s438_s28 = smov 12   ;;  %vm168_vm2 = vcmask 97280   ;;  %vm170_vm3 = vcmask 130048   ;;  %vm172_vm4 = vcmask 179200   ;;  %vm174_vm5 = vcmask 228352  }
  0x36   : > { %s439_s29 = smov 3   ;;  %s440_s30 = smov 122   ;;  %vm176_vm6 = vcmask 277504   ;;  %vm178_vm7 = vcmask 326656   ;;  %vm180_vm8 = vcmask 367616   ;;  %vm182_vm9 = vcmask 408576  }
  0x37   : > { %s441_s2 = smov 113   ;;  %s442_s3 = smov 30   ;;  %vm184_vm10 = vcmask 449536   ;;  %vm186_vm11 = vcmask 490496  }
  0x38   : > { %s443_s4 = smov 20   ;;  %s444_s17 = smov 10  }
  0x39   : > { %137 = vrot.lane.b32.xlu0 %v132_v0, %s437_s27  ;;  %143 = vrot.lane.b32.xlu1 %v132_v0, %s438_s28  ;;  %s281_s5 = sshll.u32 %s477_s10, 7  ;;  %s131_s11 = scalar_lea.vmem [#allocation5], %s278_s22 }
  0x3a   : > { %s202_s13 = sshll.u32 %s131_s11, 4  ;;  %s570_s20 = scalar_lea.hbm %s608_s1, %s281_s5  ;;  %s203_s13 = int_to_ptr.vmem [resolvable:$true] %s202_s13 }
  0x3b   : > { %s189_s10 = scalar_lea.sflag [#allocation4], %s554_s21  ;;  %s368_s23 = scalar_lea.vmem %s203_s13, 128 }
  0x3c   : > { %p369_p11 = scmp.ne.s32.totalorder %s203_s13, %s368_s23  ;;  %p619_p12 = scmp.ne.s32.totalorder %s613_s18, 0 }
  0x3d   : > { %146 = vrot.lane.b32.xlu0 %v132_v0, %s439_s29  ;;  %149 = vrot.lane.b32.xlu1 %v132_v0, %s440_s30  ;;  %s445_s22 = smov [#allocation5]  }
  0x3e   : > { %p370_p13 = pnand %p369_p11, %p619_p12  ;;  %s372_s24 = sshll.u32 %s445_s22, 4  ;;  %s373_s24 = int_to_ptr.vmem [resolvable:$false] %s372_s24 }
  0x3f   : > { %s374_s25 = scalar_lea.vmem %s373_s24, 256  ;;  %p375_p3 = scmp.lt.s32.totalorder %s203_s13, %s373_s24 }
  0x40   : > { %p371_p1 = pneg %p370_p13  ;;  %p376_p5 = scmp.lt.s32.totalorder %s374_s25, %s368_s23 }
  0x41   : > { %152 = vrot.lane.b32.xlu0 %v132_v0, %s441_s2  ;;  %155 = vrot.lane.b32.xlu1 %v132_v0, %s442_s3 }
  0x42   : > { %p377_p8 = por %p376_p5, %p375_p3 }
  0x44   : > { %p378_p10 = pnand %p377_p8, %p371_p1 }
  0x45   : > { %158 = vrot.lane.b32.xlu0 %v132_v0, %s443_s4  ;;  %161 = vrot.lane.b32.xlu1 %v132_v0, %s444_s17 }
  0xa7   : > { %v135_v1 = vpop.permute.xlu0 %134  ;;  %v141_v2 = vpop.permute.xlu1 %140 }
  0xa8   : > { %v165_v3 = vsel %vm164_vm0, %v132_v0, %v135_v1 }
  0xab   : > { %v138_v4 = vpop.permute.xlu0 %137  ;;  %v144_v5 = vpop.permute.xlu1 %143 }
  0xac   : > { %v167_v6 = vsel %vm166_vm1, %v165_v3, %v138_v4 }
  0xad   : > { %v169_v7 = vsel %vm168_vm2, %v167_v6, %v141_v2 }
  0xae   : > { %v171_v8 = vsel %vm170_vm3, %v169_v7, %v144_v5 }
  0xaf   : > { %v147_v9 = vpop.permute.xlu0 %146  ;;  %v150_v10 = vpop.permute.xlu1 %149 }
  0xb0   : > { %v173_v11 = vsel %vm172_vm4, %v171_v8, %v147_v9 }
  0xb1   : > { %v175_v12 = vsel %vm174_vm5, %v173_v11, %v150_v10 }
  0xb3   : > { %v153_v13 = vpop.permute.xlu0 %152  ;;  %v156_v14 = vpop.permute.xlu1 %155 }
  0xb4   : > { %v177_v15 = vsel %vm176_vm6, %v175_v12, %v153_v13 }
  0xb5   : > { %v179_v16 = vsel %vm178_vm7, %v177_v15, %v156_v14 }
  0xb7   : > { %v159_v17 = vpop.permute.xlu0 %158  ;;  %v162_v18 = vpop.permute.xlu1 %161 }
  0xb8   : > { %v181_v19 = vsel %vm180_vm8, %v179_v16, %v159_v17 }
  0xb9   : > { %v183_v20 = vsel %vm182_vm9, %v181_v19, %v162_v18 }
  0xba   : > { %v185_v21 = vsel %vm184_vm10, %v183_v20, %v132_v0 }
  0xbb   : > { %187 = vst.msk [vmem:[%s131_s11] sm:$0xff] %vm186_vm11, %v185_v21 }
  0xbc   : > { %381 = shalt.err (!%p378_p10)
}
  0xbd   : > { %s382_s26 = scalar_lea.hbm %s570_s20, 128  ;;  %s386_s28 = scalar_lea.hbm %s608_s1, 256 }
  0xbe   : > { %p383_p2 = scmp.ne.s32.totalorder %s570_s20, %s382_s26  ;;  %p387_p7 = scmp.lt.s32.totalorder %s570_s20, %s608_s1 }
  0xbf   : > { %p388_p0 = scmp.lt.s32.totalorder %s386_s28, %s382_s26 }
  0xc0   : > { %p384_p4 = pnand %p383_p2, %p619_p12 }
  0xc1   : > { %p389_p6 = por %p388_p0, %p387_p7 }
  0xc2   : > { %p385_p9 = pneg %p384_p4 }
  0xc4   : > { %p390_p11 = pnand %p389_p6, %p385_p9 }
  0xc6   : > { %393 = shalt.err (!%p390_p11)
}
  0xc7   : > { %286 = dma.vmem_to_hbm [thread:$0]  (%p619_p12), %s203_s13, 128, %s570_s20, %s189_s10  }
  0xc8 PF: > { %s214_s2 = sand.u32 1, %s420_s6   ;;  %p620_p13 = scmp.ne.s32.totalorder %s614_s19, 0 }
  0xc9   : > { %p621_p1 = scmp.ge.s32.totalorder %s432_s9, 2  ;;  %s215_s3 = scalar_lea.sflag [#allocation4], %s214_s2 }
  0xcb   : > { %p293_p3 = pnand %p621_p1, %p620_p13 }
  0xcd   : > { %p294_p5 = pneg %p293_p3 }
  0xcf   : > { %415 = dma.done.wait (%p294_p5), %s215_s3, 128  }
  0xd0   : > { %417 = vsyncadd (%p294_p5), %s215_s3, 4294967168  ;;  %p14_p8 = scmp.ge.s32.totalorder %s481_s12, 4   ;;  %s622_s6 = smov %s424_s7 }
  0xd1   : > { %s623_s7 = smov %s428_s8  ;;  %s624_s8 = smov %s493_s15 }
  0xd2   : > { %s625_s9 = smov %s481_s12  ;;  %16 = sbr.rel (!%p14_p8) target bundleno = 5 (0x5), region = 69 }
  0xd7   :  { %220 = vsyncpa [#allocation3], 1 }
  0xd8   :  { %222 = vsyncpa [#allocation3 + $0x1], 1 }
  0xd9   :  { %223 = vsyncpa [#allocation4], 1 }
  0xda   :  { %225 = vsyncpa [#allocation4 + $0x1], 1 }

</bundles_post_ra>
